<compile_context>
chip_gen: v7x
topology: tpu7x:2x2x1
jax: 0.10.0
libtpu: 0.0.40
codegen_flags: <defaults>
</compile_context>

<pallas_src>
import functools
import math

import jax
import jax.numpy as jnp
import numpy as np
from jax import lax
from jax.experimental import pallas as pl
from jax.experimental.pallas import tpu as pltpu

BN_EPS = 1e-5     # nn.BatchNorm1d default eps
RMS_EPS = 1e-6    # TODO(synk): btnn.RMSNorm eps unknown; using 1e-6, no affine.
NEG_INF = -1e30   # finite additive-mask value (avoids inf-inf NaNs)


def _encoder_kernel(num_heads, batch,
                    x_ref, bias_ref,
                    bn1g_ref, bn1b_ref,
                    wqkv_ref, bqkv_ref, wo_ref, bo_ref,
                    bn2g_ref, bn2b_ref,
                    w1_ref, b1_ref, w2_ref, b2_ref,
                    o_ref):
    N, D = x_ref.shape                # N = B * S (packed batch*channel rows)
    B, S, H = batch, num_heads, num_heads
    hd = D // H
    scale = 1.0 / math.sqrt(hd)
    n_red = float(B * D)              # BatchNorm1d reduces over (batch, length)

    def mm(a, b):                     # 2-D MXU matmul, f32 accumulate
        return lax.dot_general(a, b, (((1,), (0,)), ((), ())),
                               preferred_element_type=jnp.float32)

    def bn_fold(xf, g_ref, beta_ref):
        """BatchNorm1d (training/batch stats), single pass, affine folded:
        y = x * a + c  with  a = gamma*rsqrt(var+eps), c = beta - mean*a."""
        rs = jnp.sum(xf, axis=-1, keepdims=True)          # (N, 1) row sums
        rq = jnp.sum(xf * xf, axis=-1, keepdims=True)     # (N, 1) row sumsq
        ch_s, ch_q = rs[0:S], rq[0:S]
        for b in range(1, B):                             # B is tiny & static
            ch_s = ch_s + rs[b * S:(b + 1) * S]
            ch_q = ch_q + rq[b * S:(b + 1) * S]
        mean = ch_s / n_red                               # (S, 1)
        var = ch_q / n_red - mean * mean                  # biased variance
        a_ch = lax.rsqrt(var + BN_EPS) * g_ref[...]       # (S, 1)
        c_ch = beta_ref[...] - mean * a_ch                # (S, 1)
        a_rows = jnp.concatenate([a_ch] * B, axis=0)      # (N, 1)
        c_rows = jnp.concatenate([c_ch] * B, axis=0)
        return xf * a_rows + c_rows

    x = x_ref[...]                                        # (N, D)

    # ---------------- x = x + attention(bn1(x)) ------------------------------
    # TODO(synk): blocks.btAttn internals unavailable; implemented as standard
    # dense fp32 multi-head self-attention.
    xn = bn_fold(x, bn1g_ref, bn1b_ref)
    qkv = mm(xn, wqkv_ref[...]) + bqkv_ref[...]           # (N, 3D), one MXU op

    # Split heads into a leading batch dim (values stay in vregs; no scratch).
    qs = jnp.stack([qkv[:, h * hd:(h + 1) * hd] for h in range(H)], axis=0)
    ks = jnp.stack([qkv[:, D + h * hd:D + (h + 1) * hd]
                    for h in range(H)], axis=0)
    vs = jnp.stack([qkv[:, 2 * D + h * hd:2 * D + (h + 1) * hd]
                    for h in range(H)], axis=0)           # each (H, N, hd)

    # Head-batched scores over the packed B*S axis; bias_ref is 0 within a
    # batch element and NEG_INF across batch elements (block-diagonal mask).
    sc = jnp.einsum("hqd,hkd->hqk", qs, ks,
                    preferred_element_type=jnp.float32) * scale
    sc = sc + bias_ref[...]                               # (H, N, N)
    sc = sc - jnp.max(sc, axis=-1, keepdims=True)
    p = jnp.exp(sc)
    p = p * pl.reciprocal(jnp.sum(p, axis=-1, keepdims=True), approx=True)
    ph = jnp.einsum("hqk,hkd->hqd", p, vs,
                    preferred_element_type=jnp.float32)   # (H, N, hd)
    heads = jnp.concatenate([ph[h] for h in range(H)], axis=-1)   # (N, D)

    x1 = x + mm(heads, wo_ref[...]) + bo_ref[...]         # residual #1

    # ---------------- x = x + mlp(bn2(x)) -------------------------------------
    # TODO(synk): btnn.Linear is a bit/ternary linear; treated as dense fp32.
    xn2 = bn_fold(x1, bn2g_ref, bn2b_ref)
    h1 = mm(xn2, w1_ref[...]) + b1_ref[...]               # (N, M)
    rms = lax.rsqrt(jnp.mean(h1 * h1, axis=-1, keepdims=True) + RMS_EPS)
    h1 = jnp.maximum(h1 * rms, 0.0)                       # RMSNorm + ReLU
    h2 = mm(h1, w2_ref[...]) + b2_ref[...]                # (N, D)

    o_ref[...] = x1 + h2                                  # residual #2, one store


def encoder_forward(x, params, num_heads):
    B, S, D = x.shape
    assert S == num_heads, "channel axis must equal num_heads (BatchNorm1d)"
    N = B * S

    # Fuse the q/k/v projection into one (D, 3D) weight and (1, 3D) bias
    # (done once in the wrapper, outside the kernel).
    wqkv = jnp.concatenate([params["wq"], params["wk"], params["wv"]], axis=1)
    bqkv = jnp.concatenate([params["bq"], params["bk"], params["bv"]], axis=1)

    # Additive block-diagonal mask so packed rows only attend within their own
    # batch element (host-built compile-time constant).
    blk = np.arange(N) // S
    attn_bias = jnp.asarray(
        np.where(blk[:, None] == blk[None, :], 0.0, NEG_INF).astype(np.float32))

    inputs = (x.reshape(N, D), attn_bias,
              params["bn1_g"], params["bn1_b"],
              wqkv, bqkv, params["wo"], params["bo"],
              params["bn2_g"], params["bn2_b"],
              params["w1"], params["b1"], params["w2"], params["b2"])
    vmem = pl.BlockSpec(memory_space=pltpu.MemorySpace.VMEM)
    out = pl.pallas_call(
        functools.partial(_encoder_kernel, num_heads, B),
        out_shape=jax.ShapeDtypeStruct((N, D), jnp.float32),
        in_specs=[vmem] * len(inputs),
        out_specs=vmem,
    )(*inputs)
    return out.reshape(B, S, D)


def init_params(key, embed_dim, num_heads, mlp_dim):
    D, M, S = embed_dim, mlp_dim, num_heads
    ks = jax.random.split(key, 16)

    def w(k, shape, scale=0.05):
        return scale * jax.random.normal(k, shape, jnp.float32)

    return dict(
        bn1_g=1.0 + 0.1 * jax.random.normal(ks[0], (S, 1), jnp.float32),
        bn1_b=0.1 * jax.random.normal(ks[1], (S, 1), jnp.float32),
        wq=w(ks[2], (D, D)), bq=w(ks[3], (1, D)),
        wk=w(ks[4], (D, D)), bk=w(ks[5], (1, D)),
        wv=w(ks[6], (D, D)), bv=w(ks[7], (1, D)),
        wo=w(ks[8], (D, D)), bo=w(ks[9], (1, D)),
        bn2_g=1.0 + 0.1 * jax.random.normal(ks[10], (S, 1), jnp.float32),
        bn2_b=0.1 * jax.random.normal(ks[11], (S, 1), jnp.float32),
        w1=w(ks[12], (D, M)), b1=w(ks[13], (1, M)),
        w2=w(ks[14], (M, D)), b2=w(ks[15], (1, D)),
    )


def encoder_reference(x, p, num_heads):
    """Pure-JAX reference mirroring the PyTorch forward semantics."""
    B, S, D = x.shape
    hd = D // num_heads
    hi = lax.Precision.HIGHEST

    def bn(y, g, b):
        mean = jnp.mean(y, axis=(0, 2), keepdims=True)
        var = jnp.mean((y - mean) ** 2, axis=(0, 2), keepdims=True)
        return ((y - mean) * lax.rsqrt(var + BN_EPS)
                * g.reshape(1, S, 1) + b.reshape(1, S, 1))

    xn = bn(x, p["bn1_g"], p["bn1_b"])
    q = jnp.einsum("bsd,de->bse", xn, p["wq"], precision=hi) + p["bq"]
    k = jnp.einsum("bsd,de->bse", xn, p["wk"], precision=hi) + p["bk"]
    v = jnp.einsum("bsd,de->bse", xn, p["wv"], precision=hi) + p["bv"]
    q = q.reshape(B, S, num_heads, hd).transpose(0, 2, 1, 3)
    k = k.reshape(B, S, num_heads, hd).transpose(0, 2, 1, 3)
    v = v.reshape(B, S, num_heads, hd).transpose(0, 2, 1, 3)
    sc = jnp.einsum("bhsd,bhtd->bhst", q, k, precision=hi) / math.sqrt(hd)
    pm = jax.nn.softmax(sc, axis=-1)
    out = jnp.einsum("bhst,bhtd->bhsd", pm, v, precision=hi)
    out = out.transpose(0, 2, 1, 3).reshape(B, S, D)
    attn = jnp.einsum("bsd,de->bse", out, p["wo"], precision=hi) + p["bo"]
    x1 = x + attn

    xn2 = bn(x1, p["bn2_g"], p["bn2_b"])
    h1 = jnp.einsum("bsd,dm->bsm", xn2, p["w1"], precision=hi) + p["b1"]
    h1 = h1 * lax.rsqrt(jnp.mean(h1 * h1, axis=-1, keepdims=True) + RMS_EPS)
    h1 = jnp.maximum(h1, 0.0)
    h2 = jnp.einsum("bsm,md->bsd", h1, p["w2"], precision=hi) + p["b2"]
    return x1 + h2


if __name__ == "__main__":
    B, NUM_HEADS, EMBED_DIM, MLP_DIM = 2, 4, 32, 64
    S, D = NUM_HEADS, EMBED_DIM

    key = jax.random.PRNGKey(0)
    kx, kp = jax.random.split(key)
    x = jax.random.normal(kx, (B, S, D), jnp.float32)
    params = init_params(kp, EMBED_DIM, NUM_HEADS, MLP_DIM)

    out = encoder_forward(x, params, NUM_HEADS)
    out = jax.block_until_ready(out)

    ref = jax.block_until_ready(encoder_reference(x, params, NUM_HEADS))
    np.testing.assert_allclose(np.asarray(out), np.asarray(ref),
                               rtol=2e-3, atol=2e-3)
    print("KERNEL_OK")
</pallas_src>

<mosaic_0001>
module attributes {stable_mosaic.version = 11 : i64} {
  func.func @_encoder_kernel(%arg0: memref<8x32xf32, #tpu.memory_space<vmem>>, %arg1: memref<8x8xf32, #tpu.memory_space<vmem>>, %arg2: memref<4x1xf32, #tpu.memory_space<vmem>>, %arg3: memref<4x1xf32, #tpu.memory_space<vmem>>, %arg4: memref<32x96xf32, #tpu.memory_space<vmem>>, %arg5: memref<1x96xf32, #tpu.memory_space<vmem>>, %arg6: memref<32x32xf32, #tpu.memory_space<vmem>>, %arg7: memref<1x32xf32, #tpu.memory_space<vmem>>, %arg8: memref<4x1xf32, #tpu.memory_space<vmem>>, %arg9: memref<4x1xf32, #tpu.memory_space<vmem>>, %arg10: memref<32x64xf32, #tpu.memory_space<vmem>>, %arg11: memref<1x64xf32, #tpu.memory_space<vmem>>, %arg12: memref<64x32xf32, #tpu.memory_space<vmem>>, %arg13: memref<1x32xf32, #tpu.memory_space<vmem>>, %arg14: memref<8x32xf32, #tpu.memory_space<vmem>>) attributes {dimension_semantics = [], scalar_prefetch = 0 : i64, scratch_operands = 0 : i64, tpu.core_type = #tpu.core_type<tc>} {
    %c0 = arith.constant 0 : index
    %c0_0 = arith.constant 0 : index
    %0 = vector.load %arg0[%c0, %c0_0] : memref<8x32xf32, #tpu.memory_space<vmem>>, vector<8x32xf32>
    %cst = arith.constant dense<0.000000e+00> : vector<8xf32>
    %1 = vector.multi_reduction <add>, %0, %cst [1] : vector<8x32xf32> to vector<8xf32>
    %2 = vector.shape_cast %1 : vector<8xf32> to vector<8x1xf32>
    %3 = arith.mulf %0, %0 : vector<8x32xf32>
    %cst_1 = arith.constant dense<0.000000e+00> : vector<8xf32>
    %4 = vector.multi_reduction <add>, %3, %cst_1 [1] : vector<8x32xf32> to vector<8xf32>
    %5 = vector.shape_cast %4 : vector<8xf32> to vector<8x1xf32>
    %6 = vector.extract_strided_slice %2 {offsets = [0, 0], sizes = [4, 1], strides = [1, 1]} : vector<8x1xf32> to vector<4x1xf32>
    %7 = vector.extract_strided_slice %5 {offsets = [0, 0], sizes = [4, 1], strides = [1, 1]} : vector<8x1xf32> to vector<4x1xf32>
    %8 = vector.extract_strided_slice %2 {offsets = [4, 0], sizes = [4, 1], strides = [1, 1]} : vector<8x1xf32> to vector<4x1xf32>
    %9 = arith.addf %6, %8 : vector<4x1xf32>
    %10 = vector.extract_strided_slice %5 {offsets = [4, 0], sizes = [4, 1], strides = [1, 1]} : vector<8x1xf32> to vector<4x1xf32>
    %11 = arith.addf %7, %10 : vector<4x1xf32>
    %cst_2 = arith.constant 6.400000e+01 : f32
    %12 = vector.broadcast %cst_2 : f32 to vector<4x1xf32>
    %13 = arith.divf %9, %12 : vector<4x1xf32>
    %cst_3 = arith.constant 6.400000e+01 : f32
    %14 = vector.broadcast %cst_3 : f32 to vector<4x1xf32>
    %15 = arith.divf %11, %14 : vector<4x1xf32>
    %16 = arith.mulf %13, %13 : vector<4x1xf32>
    %17 = arith.subf %15, %16 : vector<4x1xf32>
    %cst_4 = arith.constant 9.99999974E-6 : f32
    %18 = vector.broadcast %cst_4 : f32 to vector<4x1xf32>
    %19 = arith.addf %17, %18 : vector<4x1xf32>
    %20 = math.rsqrt %19 : vector<4x1xf32>
    %c0_5 = arith.constant 0 : index
    %c0_6 = arith.constant 0 : index
    %21 = vector.load %arg2[%c0_5, %c0_6] : memref<4x1xf32, #tpu.memory_space<vmem>>, vector<4x1xf32>
    %22 = arith.mulf %20, %21 : vector<4x1xf32>
    %c0_7 = arith.constant 0 : index
    %c0_8 = arith.constant 0 : index
    %23 = vector.load %arg3[%c0_7, %c0_8] : memref<4x1xf32, #tpu.memory_space<vmem>>, vector<4x1xf32>
    %24 = arith.mulf %13, %22 : vector<4x1xf32>
    %25 = arith.subf %23, %24 : vector<4x1xf32>
    %26 = tpu.concatenate %22, %22 in 0 : vector<4x1xf32>, vector<4x1xf32> -> vector<8x1xf32>
    %27 = tpu.concatenate %25, %25 in 0 : vector<4x1xf32>, vector<4x1xf32> -> vector<8x1xf32>
    %28 = vector.broadcast %26 : vector<8x1xf32> to vector<8x32xf32>
    %29 = arith.mulf %0, %28 : vector<8x32xf32>
    %30 = vector.broadcast %27 : vector<8x1xf32> to vector<8x32xf32>
    %31 = arith.addf %29, %30 : vector<8x32xf32>
    %c0_9 = arith.constant 0 : index
    %c0_10 = arith.constant 0 : index
    %32 = vector.load %arg4[%c0_9, %c0_10] : memref<32x96xf32, #tpu.memory_space<vmem>>, vector<32x96xf32>
    %cst_11 = arith.constant dense<0.000000e+00> : vector<8x96xf32>
    %33 = tpu.matmul %31, %32, %cst_11 {dimension_numbers = #tpu.dot_dimension_numbers<[1], [0], [0], [1], [0, 0, 1, 1], [], []>} : vector<8x32xf32>, vector<32x96xf32>, vector<8x96xf32> -> vector<8x96xf32>
    %c0_12 = arith.constant 0 : index
    %c0_13 = arith.constant 0 : index
    %34 = vector.load %arg5[%c0_12, %c0_13] : memref<1x96xf32, #tpu.memory_space<vmem>>, vector<1x96xf32>
    %35 = vector.broadcast %34 : vector<1x96xf32> to vector<8x96xf32>
    %36 = arith.addf %33, %35 : vector<8x96xf32>
    %37 = vector.extract_strided_slice %36 {offsets = [0, 0], sizes = [8, 8], strides = [1, 1]} : vector<8x96xf32> to vector<8x8xf32>
    %38 = vector.extract_strided_slice %36 {offsets = [0, 8], sizes = [8, 8], strides = [1, 1]} : vector<8x96xf32> to vector<8x8xf32>
    %39 = vector.extract_strided_slice %36 {offsets = [0, 16], sizes = [8, 8], strides = [1, 1]} : vector<8x96xf32> to vector<8x8xf32>
    %40 = vector.extract_strided_slice %36 {offsets = [0, 24], sizes = [8, 8], strides = [1, 1]} : vector<8x96xf32> to vector<8x8xf32>
    %41 = vector.shape_cast %37 : vector<8x8xf32> to vector<1x8x8xf32>
    %42 = vector.shape_cast %38 : vector<8x8xf32> to vector<1x8x8xf32>
    %43 = vector.shape_cast %39 : vector<8x8xf32> to vector<1x8x8xf32>
    %44 = vector.shape_cast %40 : vector<8x8xf32> to vector<1x8x8xf32>
    %45 = tpu.concatenate %41, %42, %43, %44 in 0 : vector<1x8x8xf32>, vector<1x8x8xf32>, vector<1x8x8xf32>, vector<1x8x8xf32> -> vector<4x8x8xf32>
    %46 = vector.extract_strided_slice %36 {offsets = [0, 32], sizes = [8, 8], strides = [1, 1]} : vector<8x96xf32> to vector<8x8xf32>
    %47 = vector.extract_strided_slice %36 {offsets = [0, 40], sizes = [8, 8], strides = [1, 1]} : vector<8x96xf32> to vector<8x8xf32>
    %48 = vector.extract_strided_slice %36 {offsets = [0, 48], sizes = [8, 8], strides = [1, 1]} : vector<8x96xf32> to vector<8x8xf32>
    %49 = vector.extract_strided_slice %36 {offsets = [0, 56], sizes = [8, 8], strides = [1, 1]} : vector<8x96xf32> to vector<8x8xf32>
    %50 = vector.shape_cast %46 : vector<8x8xf32> to vector<1x8x8xf32>
    %51 = vector.shape_cast %47 : vector<8x8xf32> to vector<1x8x8xf32>
    %52 = vector.shape_cast %48 : vector<8x8xf32> to vector<1x8x8xf32>
    %53 = vector.shape_cast %49 : vector<8x8xf32> to vector<1x8x8xf32>
    %54 = tpu.concatenate %50, %51, %52, %53 in 0 : vector<1x8x8xf32>, vector<1x8x8xf32>, vector<1x8x8xf32>, vector<1x8x8xf32> -> vector<4x8x8xf32>
    %55 = vector.extract_strided_slice %36 {offsets = [0, 64], sizes = [8, 8], strides = [1, 1]} : vector<8x96xf32> to vector<8x8xf32>
    %56 = vector.extract_strided_slice %36 {offsets = [0, 72], sizes = [8, 8], strides = [1, 1]} : vector<8x96xf32> to vector<8x8xf32>
    %57 = vector.extract_strided_slice %36 {offsets = [0, 80], sizes = [8, 8], strides = [1, 1]} : vector<8x96xf32> to vector<8x8xf32>
    %58 = vector.extract_strided_slice %36 {offsets = [0, 88], sizes = [8, 8], strides = [1, 1]} : vector<8x96xf32> to vector<8x8xf32>
    %59 = vector.shape_cast %55 : vector<8x8xf32> to vector<1x8x8xf32>
    %60 = vector.shape_cast %56 : vector<8x8xf32> to vector<1x8x8xf32>
    %61 = vector.shape_cast %57 : vector<8x8xf32> to vector<1x8x8xf32>
    %62 = vector.shape_cast %58 : vector<8x8xf32> to vector<1x8x8xf32>
    %63 = tpu.concatenate %59, %60, %61, %62 in 0 : vector<1x8x8xf32>, vector<1x8x8xf32>, vector<1x8x8xf32>, vector<1x8x8xf32> -> vector<4x8x8xf32>
    "tpu.trace_start"() <{level = 10 : i32, message = "hqd,hkd->hqk"}> : () -> ()
    %cst_14 = arith.constant dense<0.000000e+00> : vector<4x8x8xf32>
    %64 = tpu.matmul %45, %54, %cst_14 {dimension_numbers = #tpu.dot_dimension_numbers<[2], [2], [1], [1], [0, 0, 0, 1, 1, 1], [0], [0]>} : vector<4x8x8xf32>, vector<4x8x8xf32>, vector<4x8x8xf32> -> vector<4x8x8xf32>
    "tpu.trace_stop"() : () -> ()
    %cst_15 = arith.constant 0.353553385 : f32
    %65 = vector.broadcast %cst_15 : f32 to vector<4x8x8xf32>
    %66 = arith.mulf %64, %65 : vector<4x8x8xf32>
    %c0_16 = arith.constant 0 : index
    %c0_17 = arith.constant 0 : index
    %67 = vector.load %arg1[%c0_16, %c0_17] : memref<8x8xf32, #tpu.memory_space<vmem>>, vector<8x8xf32>
    %68 = vector.shape_cast %67 : vector<8x8xf32> to vector<1x8x8xf32>
    %69 = vector.broadcast %68 : vector<1x8x8xf32> to vector<4x8x8xf32>
    %70 = arith.addf %66, %69 : vector<4x8x8xf32>
    %cst_18 = arith.constant dense<0xFF800000> : vector<4x8xf32>
    %71 = vector.multi_reduction <maximumf>, %70, %cst_18 [2] : vector<4x8x8xf32> to vector<4x8xf32>
    %72 = vector.shape_cast %71 : vector<4x8xf32> to vector<4x8x1xf32>
    %73 = vector.broadcast %72 : vector<4x8x1xf32> to vector<4x8x8xf32>
    %74 = arith.subf %70, %73 : vector<4x8x8xf32>
    %75 = math.exp %74 : vector<4x8x8xf32>
    %cst_19 = arith.constant dense<0.000000e+00> : vector<4x8xf32>
    %76 = vector.multi_reduction <add>, %75, %cst_19 [2] : vector<4x8x8xf32> to vector<4x8xf32>
    %77 = vector.shape_cast %76 : vector<4x8xf32> to vector<4x8x1xf32>
    %78 = tpu.reciprocal %77 {approx = true} : vector<4x8x1xf32> -> vector<4x8x1xf32>
    %79 = vector.broadcast %78 : vector<4x8x1xf32> to vector<4x8x8xf32>
    %80 = arith.mulf %75, %79 : vector<4x8x8xf32>
    "tpu.trace_start"() <{level = 10 : i32, message = "hqk,hkd->hqd"}> : () -> ()
    %cst_20 = arith.constant dense<0.000000e+00> : vector<4x8x8xf32>
    %81 = tpu.matmul %80, %63, %cst_20 {dimension_numbers = #tpu.dot_dimension_numbers<[2], [1], [1], [2], [0, 0, 0, 1, 1, 2], [0], [0]>} : vector<4x8x8xf32>, vector<4x8x8xf32>, vector<4x8x8xf32> -> vector<4x8x8xf32>
    "tpu.trace_stop"() : () -> ()
    %82 = vector.extract_strided_slice %81 {offsets = [0, 0, 0], sizes = [1, 8, 8], strides = [1, 1, 1]} : vector<4x8x8xf32> to vector<1x8x8xf32>
    %83 = vector.shape_cast %82 : vector<1x8x8xf32> to vector<8x8xf32>
    %84 = vector.extract_strided_slice %81 {offsets = [1, 0, 0], sizes = [1, 8, 8], strides = [1, 1, 1]} : vector<4x8x8xf32> to vector<1x8x8xf32>
    %85 = vector.shape_cast %84 : vector<1x8x8xf32> to vector<8x8xf32>
    %86 = vector.extract_strided_slice %81 {offsets = [2, 0, 0], sizes = [1, 8, 8], strides = [1, 1, 1]} : vector<4x8x8xf32> to vector<1x8x8xf32>
    %87 = vector.shape_cast %86 : vector<1x8x8xf32> to vector<8x8xf32>
    %88 = vector.extract_strided_slice %81 {offsets = [3, 0, 0], sizes = [1, 8, 8], strides = [1, 1, 1]} : vector<4x8x8xf32> to vector<1x8x8xf32>
    %89 = vector.shape_cast %88 : vector<1x8x8xf32> to vector<8x8xf32>
    %90 = tpu.concatenate %83, %85, %87, %89 in 1 : vector<8x8xf32>, vector<8x8xf32>, vector<8x8xf32>, vector<8x8xf32> -> vector<8x32xf32>
    %c0_21 = arith.constant 0 : index
    %c0_22 = arith.constant 0 : index
    %91 = vector.load %arg6[%c0_21, %c0_22] : memref<32x32xf32, #tpu.memory_space<vmem>>, vector<32x32xf32>
    %cst_23 = arith.constant dense<0.000000e+00> : vector<8x32xf32>
    %92 = tpu.matmul %90, %91, %cst_23 {dimension_numbers = #tpu.dot_dimension_numbers<[1], [0], [0], [1], [0, 0, 1, 1], [], []>} : vector<8x32xf32>, vector<32x32xf32>, vector<8x32xf32> -> vector<8x32xf32>
    %93 = arith.addf %0, %92 : vector<8x32xf32>
    %c0_24 = arith.constant 0 : index
    %c0_25 = arith.constant 0 : index
    %94 = vector.load %arg7[%c0_24, %c0_25] : memref<1x32xf32, #tpu.memory_space<vmem>>, vector<1x32xf32>
    %95 = vector.broadcast %94 : vector<1x32xf32> to vector<8x32xf32>
    %96 = arith.addf %93, %95 : vector<8x32xf32>
    %cst_26 = arith.constant dense<0.000000e+00> : vector<8xf32>
    %97 = vector.multi_reduction <add>, %96, %cst_26 [1] : vector<8x32xf32> to vector<8xf32>
    %98 = vector.shape_cast %97 : vector<8xf32> to vector<8x1xf32>
    %99 = arith.mulf %96, %96 : vector<8x32xf32>
    %cst_27 = arith.constant dense<0.000000e+00> : vector<8xf32>
    %100 = vector.multi_reduction <add>, %99, %cst_27 [1] : vector<8x32xf32> to vector<8xf32>
    %101 = vector.shape_cast %100 : vector<8xf32> to vector<8x1xf32>
    %102 = vector.extract_strided_slice %98 {offsets = [0, 0], sizes = [4, 1], strides = [1, 1]} : vector<8x1xf32> to vector<4x1xf32>
    %103 = vector.extract_strided_slice %101 {offsets = [0, 0], sizes = [4, 1], strides = [1, 1]} : vector<8x1xf32> to vector<4x1xf32>
    %104 = vector.extract_strided_slice %98 {offsets = [4, 0], sizes = [4, 1], strides = [1, 1]} : vector<8x1xf32> to vector<4x1xf32>
    %105 = arith.addf %102, %104 : vector<4x1xf32>
    %106 = vector.extract_strided_slice %101 {offsets = [4, 0], sizes = [4, 1], strides = [1, 1]} : vector<8x1xf32> to vector<4x1xf32>
    %107 = arith.addf %103, %106 : vector<4x1xf32>
    %cst_28 = arith.constant 6.400000e+01 : f32
    %108 = vector.broadcast %cst_28 : f32 to vector<4x1xf32>
    %109 = arith.divf %105, %108 : vector<4x1xf32>
    %cst_29 = arith.constant 6.400000e+01 : f32
    %110 = vector.broadcast %cst_29 : f32 to vector<4x1xf32>
    %111 = arith.divf %107, %110 : vector<4x1xf32>
    %112 = arith.mulf %109, %109 : vector<4x1xf32>
    %113 = arith.subf %111, %112 : vector<4x1xf32>
    %cst_30 = arith.constant 9.99999974E-6 : f32
    %114 = vector.broadcast %cst_30 : f32 to vector<4x1xf32>
    %115 = arith.addf %113, %114 : vector<4x1xf32>
    %116 = math.rsqrt %115 : vector<4x1xf32>
    %c0_31 = arith.constant 0 : index
    %c0_32 = arith.constant 0 : index
    %117 = vector.load %arg8[%c0_31, %c0_32] : memref<4x1xf32, #tpu.memory_space<vmem>>, vector<4x1xf32>
    %118 = arith.mulf %116, %117 : vector<4x1xf32>
    %c0_33 = arith.constant 0 : index
    %c0_34 = arith.constant 0 : index
    %119 = vector.load %arg9[%c0_33, %c0_34] : memref<4x1xf32, #tpu.memory_space<vmem>>, vector<4x1xf32>
    %120 = arith.mulf %109, %118 : vector<4x1xf32>
    %121 = arith.subf %119, %120 : vector<4x1xf32>
    %122 = tpu.concatenate %118, %118 in 0 : vector<4x1xf32>, vector<4x1xf32> -> vector<8x1xf32>
    %123 = tpu.concatenate %121, %121 in 0 : vector<4x1xf32>, vector<4x1xf32> -> vector<8x1xf32>
    %124 = vector.broadcast %122 : vector<8x1xf32> to vector<8x32xf32>
    %125 = arith.mulf %96, %124 : vector<8x32xf32>
    %126 = vector.broadcast %123 : vector<8x1xf32> to vector<8x32xf32>
    %127 = arith.addf %125, %126 : vector<8x32xf32>
    %c0_35 = arith.constant 0 : index
    %c0_36 = arith.constant 0 : index
    %128 = vector.load %arg10[%c0_35, %c0_36] : memref<32x64xf32, #tpu.memory_space<vmem>>, vector<32x64xf32>
    %cst_37 = arith.constant dense<0.000000e+00> : vector<8x64xf32>
    %129 = tpu.matmul %127, %128, %cst_37 {dimension_numbers = #tpu.dot_dimension_numbers<[1], [0], [0], [1], [0, 0, 1, 1], [], []>} : vector<8x32xf32>, vector<32x64xf32>, vector<8x64xf32> -> vector<8x64xf32>
    %c0_38 = arith.constant 0 : index
    %c0_39 = arith.constant 0 : index
    %130 = vector.load %arg11[%c0_38, %c0_39] : memref<1x64xf32, #tpu.memory_space<vmem>>, vector<1x64xf32>
    %131 = vector.broadcast %130 : vector<1x64xf32> to vector<8x64xf32>
    %132 = arith.addf %129, %131 : vector<8x64xf32>
    %133 = arith.mulf %132, %132 : vector<8x64xf32>
    %cst_40 = arith.constant dense<0.000000e+00> : vector<8xf32>
    %134 = vector.multi_reduction <add>, %133, %cst_40 [1] : vector<8x64xf32> to vector<8xf32>
    %135 = vector.shape_cast %134 : vector<8xf32> to vector<8x1xf32>
    %cst_41 = arith.constant 6.400000e+01 : f32
    %136 = vector.broadcast %cst_41 : f32 to vector<8x1xf32>
    %137 = arith.divf %135, %136 : vector<8x1xf32>
    %cst_42 = arith.constant 9.99999997E-7 : f32
    %138 = vector.broadcast %cst_42 : f32 to vector<8x1xf32>
    %139 = arith.addf %137, %138 : vector<8x1xf32>
    %140 = math.rsqrt %139 : vector<8x1xf32>
    %141 = vector.broadcast %140 : vector<8x1xf32> to vector<8x64xf32>
    %142 = arith.mulf %132, %141 : vector<8x64xf32>
    %cst_43 = arith.constant 0.000000e+00 : f32
    %143 = vector.broadcast %cst_43 : f32 to vector<8x64xf32>
    %144 = arith.maximumf %142, %143 : vector<8x64xf32>
    %c0_44 = arith.constant 0 : index
    %c0_45 = arith.constant 0 : index
    %145 = vector.load %arg12[%c0_44, %c0_45] : memref<64x32xf32, #tpu.memory_space<vmem>>, vector<64x32xf32>
    %cst_46 = arith.constant dense<0.000000e+00> : vector<8x32xf32>
    %146 = tpu.matmul %144, %145, %cst_46 {dimension_numbers = #tpu.dot_dimension_numbers<[1], [0], [0], [1], [0, 0, 1, 1], [], []>} : vector<8x64xf32>, vector<64x32xf32>, vector<8x32xf32> -> vector<8x32xf32>
    %c0_47 = arith.constant 0 : index
    %c0_48 = arith.constant 0 : index
    %147 = vector.load %arg13[%c0_47, %c0_48] : memref<1x32xf32, #tpu.memory_space<vmem>>, vector<1x32xf32>
    %148 = vector.broadcast %147 : vector<1x32xf32> to vector<8x32xf32>
    %149 = arith.addf %146, %148 : vector<8x32xf32>
    %150 = arith.addf %96, %149 : vector<8x32xf32>
    %c0_49 = arith.constant 0 : index
    %c0_50 = arith.constant 0 : index
    %151 = vector.load %arg14[%c0_49, %c0_50] : memref<8x32xf32, #tpu.memory_space<vmem>>, vector<8x32xf32>
    tpu.vector_store %arg14[%c0_49, %c0_50], %150 {strides = array<i32>} : memref<8x32xf32, #tpu.memory_space<vmem>>, vector<8x32xf32>,
    return
  }
}

</mosaic_0001>

<bundles_post_ra>
// kernel: tpu_custom_call.1
= control target key start
LH: loop header
LB: loop body
LE: loop exit
PB: predicated region body
PF: predicated region fallthrough
CT: control target
= control target key end

     0   :  { %vm49_vm0 = vcmask 261120   ;;  %s1741_s0 = inlined_call_operand.vmem [shape: f32[8,32], index: 0, kind: input, shape index: {}]   ;;  %s1742_s1 = inlined_call_operand.vmem [shape: f32[8,8], index: 1, kind: input, shape index: {}]   ;;  %s1743_s2 = inlined_call_operand.vmem [shape: f32[4,1], index: 2, kind: input, shape index: {}]   ;;  %s1744_s3 = inlined_call_operand.vmem [shape: f32[4,1], index: 3, kind: input, shape index: {}]   ;;  %s1745_s4 = inlined_call_operand.vmem [shape: f32[32,96], index: 4, kind: input, shape index: {}]   ;;  %s1746_s5 = inlined_call_operand.vmem [shape: f32[1,96], index: 5, kind: input, shape index: {}]   ;;  %s1747_s6 = inlined_call_operand.vmem [shape: f32[32,32], index: 6, kind: input, shape index: {}]   ;;  %s1748_s7 = inlined_call_operand.vmem [shape: f32[1,32], index: 7, kind: input, shape index: {}]   ;;  %s1749_s8 = inlined_call_operand.vmem [shape: f32[4,1], index: 8, kind: input, shape index: {}]   ;;  %s1750_s9 = inlined_call_operand.vmem [shape: f32[4,1], index: 9, kind: input, shape index: {}]   ;;  %s1751_s10 = inlined_call_operand.vmem [shape: f32[32,64], index: 10, kind: input, shape index: {}]   ;;  %s1752_s11 = inlined_call_operand.vmem [shape: f32[1,64], index: 11, kind: input, shape index: {}]   ;;  %s1753_s12 = inlined_call_operand.vmem [shape: f32[64,32], index: 12, kind: input, shape index: {}]   ;;  %s1754_s13 = inlined_call_operand.vmem [shape: f32[1,32], index: 13, kind: input, shape index: {}]   ;;  %s1755_s14 = inlined_call_operand.hbm [shape: f32[8,32], index: 14, kind: output, shape index: {}]  }
   0x1   :  { %v1532_v0 = vld [vmem:[%s1741_s0] sm:$0xff] }
   0x2   :  { %19 = vsyncpa [#allocation3], 0  ;;  %v50_v1 = vsel %vm49_vm0, %v1532_v0, 0.0  ;;  %v53_v2 = vmul.f32 %v1532_v0, %v1532_v0  ;;  %v1441_v4 = vmov 0   ;;  %v98_v5 = vld [vmem:[%s1745_s4] sm:$0xff]  ;;  %v99_v6 = vld [vmem:[%s1745_s4 + $0x8] sm:$0xff] }
   0x3   :  { %51 = vadd.xlane.f32.xlu0 %v50_v1  ;;  %1393 = vset.pattern.permute.xlu1 %v1441_v4  ;;  %v1442_v7 = vmov 0.0|0.0   ;;  %v1351_v8 = vpack.c.bf16 %v99_v6, %v98_v5  ;;  %v72_v20 = vld [vmem:[%s1743_s2] sm:$0xf]  ;;  %vm80_vm1 = vcmask 1043456   ;;  %v100_v28 = vld [vmem:[%s1745_s4 + $0x10] sm:$0xff]  ;;  %v101_v29 = vld [vmem:[%s1745_s4 + $0x18] sm:$0xff] }
   0x4   :  { %v54_v3 = vsel %vm49_vm0, %v53_v2, 0.0  ;;  %1394 = vset.pattern.permute.xlu0 %v1441_v4  ;;  %1350 = vmatprep.subr.bf16.mxu1 %v1442_v7  ;;  %v74_v23 = vld [vmem:[%s1744_s3] sm:$0xf]  ;;  %v1354_v31 = vpack.c.bf16 %v101_v29, %v100_v28  ;;  %vm1443_vm2 = vmmov 0   ;;  %v1444_v33 = vmov 0.0   ;;  %s1445_s4 = smov 112  }
   0x5   :  { %1352 = vmatpush3.bf16.msra.mxu1 %v1351_v8  ;;  %1266 = vmatprep.mubr.msk.f32.mxu1 %vm1443_vm2, %v1444_v33  ;;  %v1198_v38 = vld [vmem:[%s1746_s5] ss:$0 sm:$0xff]  ;;  %s1446_s26 = smov 120   ;;  %s1447_s27 = smov 104   ;;  %vm191_vm3 = vcmask 64512   ;;  %vm864_vm4 = vcmask 130048  }
   0x6   :  { %1353 = vmatprep.subr.bf16.mxu1 %v1442_v7  ;;  %1279 = vmatprep.subr.mxu0 %v1444_v33  ;;  %s1448_s28 = smov 96   ;;  %v498_v50 = vld [vmem:[%s1742_s1] sm:$0xff]  ;;  %s1449_s1 = smov 64   ;;  %vm866_vm5 = vcmask 195584   ;;  %vm1085_vm6 = vcmask 523264  }
   0x7   :  { %55 = vadd.xlane.f32.xlu0 %v54_v3  ;;  %1281 = vmatprep.mubr.msk.f32.mxu0 %vm1443_vm2, %v1444_v33  ;;  %s1450_s21 = smov 8   ;;  %s1451_s22 = smov 16  }
   0x8   :  { %s1452_s23 = smov 24  }
   0x9   :  { %1355 = vmatpush3.bf16.msra.mxu1 %v1354_v31 }
   0xa   :  { %1269 = vmatprep.subr.mxu1 %v1444_v33 }
  0x90   :  { %v52_v9 = vpop.xlane.xlu0 %51 }
  0x91   :  { %v58_v10 = vrot.slane %v52_v9, 4 }
  0x93   :  { %v60_v11 = vadd.f32 %v58_v10, %v52_v9 }
  0x94   :  { %v56_v12 = vpop.xlane.xlu0 %55 }
  0x95   :  { %v66_v13 = vmul.f32 0.015625, %v60_v11  ;;  %v62_v14 = vrot.slane %v56_v12, 4 }
  0x97   :  { %v64_v15 = vadd.f32 %v62_v14, %v56_v12  ;;  %v68_v16 = vmul.f32 %v66_v13, %v66_v13 }
  0x99   :  { %v67_v17 = vmul.f32 0.015625, %v64_v15 }
  0x9b   :  { %v69_v18 = vsub.f32 %v67_v17, %v68_v16 }
  0x9d   :  { %v70_v19 = vadd.f32 1e-05, %v69_v18 }
  0x9f   :  { %1395 = vrsqrt.f32 %v70_v19 }
  0xa9   :  { %v1396_v21 = vpop.eup %1395 }
  0xaa   :  { %v73_v22 = vmul.f32 %v1396_v21, %v72_v20 }
  0xac   :  { %v78_v24 = vrot.slane %v73_v22, 4  ;;  %v75_v25 = vmul.f32 %v73_v22, %v66_v13 }
  0xae   :  { %v81_v26 = vsel %vm80_vm1, %v73_v22, %v78_v24  ;;  %v76_v27 = vsub.f32 %v74_v23, %v75_v25 }
  0xaf   :  { %88 = vperm.xlu1 %1393, %v81_v26  }
  0xb0   :  { %v83_v30 = vrot.slane %v76_v27, 4 }
  0xb2   :  { %v85_v32 = vsel %vm80_vm1, %v76_v27, %v83_v30 }
  0xb3   :  { %94 = vperm.xlu1 %1393, %v85_v32  }
 0x12e   :  { %v89_v34 = vpop.permute.xlu1 %88 }
 0x12f   :  { %v91_v35 = vmul.f32 %v89_v34, %v1532_v0 }
 0x132   :  { %v95_v36 = vpop.permute.xlu1 %94 }
 0x133   :  { %v97_v37 = vadd.f32 %v95_v36, %v91_v35 }
 0x135   :  { %1267 = vmatmul.mubr.msk.f32.vlgmr.msra.gmra.mrb[0].mxu1 %vm49_vm0, %v97_v37 }
 0x136   :  { %1271 = vmatprep.mubr.msk.f32.mxu1 %vm1443_vm2, %v1444_v33 }
 0x208   :  { %v178_v39 = vpop.f32.mrb[0].mxu1 }
 0x209   :  { %v179_v40 = vadd.f32 %v1198_v38, %v178_v39  ;;  %v1268_v41 = vpop.f32.mrb[1].mxu1 }
 0x20b   :  { %185 = vrot.lane.b32.xlu1 %v179_v40, %s1445_s4  ;;  %183 = vrot.lane.b32.xlu0 %v179_v40, %s1446_s26  ;;  %s1453_s4 = smov [#allocation2]  }
 0x20c   :  { %s1190_s26 = sshll.u32 %s1453_s4, 4  ;;  %s1191_s26 = int_to_ptr.vmem [resolvable:$true] %s1190_s26 }
 0x20d   :  { %p1422_p1 = scmp.lt.s32.totalorder %s1191_s26, %s1191_s26 }
 0x20f   :  { %187 = vrot.lane.b32.xlu1 %v179_v40, %s1447_s27 }
 0x213   :  { %189 = vrot.lane.b32.xlu1 %v179_v40, %s1448_s28 }
 0x27d   :  { %v1574_v42 = vpop.permute.xlu1 %185  ;;  %v1576_v43 = vpop.permute.xlu0 %183 }
 0x27e   :  { %266 = vrot.lane.b32.xlu1 %v1576_v43, %s1448_s28 }
 0x281   :  { %v1579_v44 = vpop.permute.xlu1 %187 }
 0x282   :  { %342 = vrot.lane.b32.xlu1 %v1574_v42, %s1448_s28 }
 0x285   :  { %v190_v45 = vpop.permute.xlu1 %189 }
 0x286   :  { %1270 = vmatpush3.xpose.msk.msra.mxu1 %vm191_vm3, %v190_v45  ;;  %418 = vrot.lane.b32.xlu1 %v1579_v44, %s1448_s28 }
 0x287   :  { %1274 = vmatprep.subr.mxu1 %v1444_v33 }
 0x289   :  { %1272 = vmatmul.mubr.msk.f32.vlgmr.msra.gmra.mrb[2].mxu1 %vm191_vm3, %v179_v40 }
 0x28a   :  { %1276 = vmatprep.mubr.msk.f32.mxu1 %vm1443_vm2, %v1444_v33 }
 0x2f0   :  { %v267_v46 = vpop.permute.xlu1 %266 }
 0x2f1   :  { %1275 = vmatpush3.xpose.msk.msra.mxu1 %vm191_vm3, %v267_v46 }
 0x2f2   :  { %1284 = vmatprep.subr.mxu1 %v1444_v33 }
 0x2f4   :  { %1277 = vmatmul.mubr.msk.f32.vlgmr.msra.gmra.mrb[4].mxu1 %vm191_vm3, %v1576_v43  ;;  %v343_v47 = vpop.permute.xlu1 %342 }
 0x2f5   :  { %1280 = vmatpush3.xpose.msk.msra.mxu0 %vm191_vm3, %v343_v47  ;;  %1286 = vmatprep.mubr.msk.f32.mxu1 %vm1443_vm2, %v1444_v33  ;;  %v868_v47 = vld [vmem:[%s1747_s6] sm:$0xff] }
 0x2f6   :  { %1289 = vmatprep.subr.mxu0 %v1444_v33 }
 0x2f8   :  { %1282 = vmatmul.mubr.msk.f32.vlgmr.msra.gmra.mrb[0].mxu0 %vm191_vm3, %v1574_v42  ;;  %v419_v48 = vpop.permute.xlu1 %418 }
 0x2f9   :  { %1285 = vmatpush3.xpose.msk.msra.mxu1 %vm191_vm3, %v419_v48  ;;  %1291 = vmatprep.mubr.msk.f32.mxu0 %vm1443_vm2, %v1444_v33  ;;  %v869_v48 = vld [vmem:[%s1747_s6 + $0x8] sm:$0xff] }
 0x2fa   :  { %1294 = vmatprep.subr.mxu1 %v1444_v33 }
 0x2fc   :  { %1287 = vmatmul.mubr.msk.f32.vlgmr.msra.gmra.mrb[6].mxu1 %vm191_vm3, %v1579_v44 }
 0x2fd   :  { %1296 = vmatprep.mubr.msk.f32.mxu1 %vm1443_vm2, %v1444_v33 }
 0x35c   :  { %v262_v49 = vpop.f32.mrb[2].mxu1 }
 0x35d   :  { %v494_v51 = vmul.f32 0.35355338, %v262_v49  ;;  %v1273_v52 = vpop.f32.mrb[3].mxu1  ;;  %v1357_v49 = vpack.c.bf16 %v869_v48, %v868_v47  ;;  %v1094_v47 = vld [vmem:[%s1753_s12] sm:$0xff]  ;;  %v1095_v48 = vld [vmem:[%s1753_s12 + $0x8] sm:$0xff] }
 0x35f   :  { %v499_v53 = vadd.f32 %v498_v50, %v494_v51  ;;  %v871_v51 = vld [vmem:[%s1747_s6 + $0x18] sm:$0xff] }
 0x361   :  { %v503_v54 = vsel %vm191_vm3, %v499_v53, -inf }
 0x362   :  { %504 = vmax.xlane.f32.xlu0 %v503_v54 }
 0x3c7   :  { %v338_v55 = vpop.f32.mrb[4].mxu1 }
 0x3c8   :  { %v495_v56 = vmul.f32 0.35355338, %v338_v55  ;;  %v1278_v57 = vpop.f32.mrb[5].mxu1 }
 0x3ca   :  { %v500_v58 = vadd.f32 %v498_v50, %v495_v56 }
 0x3cb   :  { %v414_v59 = vpop.f32.mrb[0].mxu0 }
 0x3cc   :  { %v496_v60 = vmul.f32 0.35355338, %v414_v59  ;;  %v1283_v61 = vpop.f32.mrb[1].mxu0  ;;  %v506_v62 = vsel %vm191_vm3, %v500_v58, -inf }
 0x3cd   :  { %507 = vmax.xlane.f32.xlu1 %v506_v62 }
 0x3ce   :  { %v501_v63 = vadd.f32 %v498_v50, %v496_v60 }
 0x3cf   :  { %v490_v1 = vpop.f32.mrb[6].mxu1 }
 0x3d0   :  { %v497_v2 = vmul.f32 0.35355338, %v490_v1  ;;  %v1288_v3 = vpop.f32.mrb[7].mxu1  ;;  %v509_v4 = vsel %vm191_vm3, %v501_v63, -inf }
 0x3d1   :  { %510 = vmax.xlane.f32.xlu0 %v509_v4  ;;  %v1213_v3 = vld [vmem:[%s1748_s7] ss:$0 sm:$0xff] }
 0x3d2   :  { %v502_v5 = vadd.f32 %v498_v50, %v497_v2  ;;  %v870_v50 = vld [vmem:[%s1747_s6 + $0x10] sm:$0xff] }
 0x3d3   :  { %v1360_v52 = vpack.c.bf16 %v871_v51, %v870_v50  ;;  %v1096_v50 = vld [vmem:[%s1753_s12 + $0x10] sm:$0xff]  ;;  %v1097_v51 = vld [vmem:[%s1753_s12 + $0x18] sm:$0xff] }
 0x3d4   :  { %v512_v6 = vsel %vm191_vm3, %v502_v5, -inf }
 0x3d5   :  { %513 = vmax.xlane.f32.xlu0 %v512_v6 }
 0x3de   :  { %547 = vrot.lane.b32.xlu1 %v179_v40, %s1449_s1 }
 0x3ef   :  { %v505_v8 = vpop.xlane.xlu0 %504 }
 0x3f0   :  { %v515_v9 = vsub.f32 %v499_v53, %v505_v8 }
 0x3f2   :  { %v519_v10 = vmul.f32 1.442695, %v515_v9 }
 0x3f4   :  { %1397 = vpow2.f32 %v519_v10 }
 0x3fe   :  { %v1398_v11 = vpop.eup %1397 }
 0x3ff   :  { %v527_v12 = vsel %vm191_vm3, %v1398_v11, 0.0 }
 0x402   :  { %528 = vadd.xlane.f32.xlu1 %v527_v12 }
 0x45a   :  { %v508_v13 = vpop.xlane.xlu1 %507 }
 0x45b   :  { %v516_v14 = vsub.f32 %v500_v58, %v508_v13 }
 0x45d   :  { %v521_v15 = vmul.f32 1.442695, %v516_v14 }
 0x45e   :  { %v511_v16 = vpop.xlane.xlu0 %510  ;;  %v548_v17 = vpop.permute.xlu1 %547 }
 0x45f   :  { %1399 = vpow2.f32 %v521_v15  ;;  %v517_v18 = vsub.f32 %v501_v63, %v511_v16  ;;  %1290 = vmatpush3.msra.mxu0 %v548_v17 }
 0x460   :  { %1299 = vmatprep.subr.mxu0 %v1444_v33 }
 0x461   :  { %v523_v19 = vmul.f32 1.442695, %v517_v18 }
 0x462   :  { %v514_v20 = vpop.xlane.xlu0 %513 }
 0x463   :  { %1401 = vpow2.f32 %v523_v19  ;;  %v518_v21 = vsub.f32 %v502_v5, %v514_v20 }
 0x465   :  { %v525_v22 = vmul.f32 1.442695, %v518_v21 }
 0x467   :  { %1403 = vpow2.f32 %v525_v22 }
 0x469   :  { %v1400_v23 = vpop.eup %1399 }
 0x46a   :  { %v530_v24 = vsel %vm191_vm3, %v1400_v23, 0.0 }
 0x46b   :  { %531 = vadd.xlane.f32.xlu0 %v530_v24 }
 0x46d   :  { %v1402_v25 = vpop.eup %1401 }
 0x46e   :  { %v533_v26 = vsel %vm191_vm3, %v1402_v25, 0.0 }
 0x46f   :  { %534 = vadd.xlane.f32.xlu1 %v533_v26  ;;  %v977_v26 = vld [vmem:[%s1750_s9] sm:$0xf] }
 0x471   :  { %v1404_v27 = vpop.eup %1403 }
 0x472   :  { %v536_v28 = vsel %vm191_vm3, %v1404_v27, 0.0 }
 0x473   :  { %537 = vadd.xlane.f32.xlu0 %v536_v28 }
 0x480   :  { %699 = vrot.lane.b32.xlu1 %v1574_v42, %s1449_s1 }
 0x484   :  { %775 = vrot.lane.b32.xlu1 %v1579_v44, %s1449_s1 }
 0x489   :  { %623 = vrot.lane.b32.xlu0 %v1576_v43, %s1449_s1 }
 0x48f   :  { %v529_v29 = vpop.xlane.xlu1 %528 }
 0x490   :  { %1405 = vrcp.f32 %v529_v29 }
 0x49a   :  { %v1406_v30 = vpop.eup %1405 }
 0x49b   :  { %v543_v31 = vmul.f32 %v1406_v30, %v1398_v11 }
 0x49d   :  { %1292 = vmatmul.mubr.msk.f32.vlgmr.msra.gmra.mrb[2].mxu0 %vm191_vm3, %v543_v31  ;;  %v1002_v31 = vld [vmem:[%s1751_s10 + $0x10] sm:$0xff] }
 0x49e   :  { %1301 = vmatprep.mubr.msk.f32.mxu0 %vm1443_vm2, %v1444_v33 }
 0x4f8   :  { %v532_v32 = vpop.xlane.xlu0 %531 }
 0x4f9   :  { %1407 = vrcp.f32 %v532_v32  ;;  %v1003_v32 = vld [vmem:[%s1751_s10 + $0x18] sm:$0xff] }
 0x4fc   :  { %v535_v34 = vpop.xlane.xlu1 %534 }
 0x4fd   :  { %1409 = vrcp.f32 %v535_v34 }
 0x500   :  { %v700_v35 = vpop.permute.xlu1 %699  ;;  %v538_v36 = vpop.xlane.xlu0 %537 }
 0x501   :  { %1411 = vrcp.f32 %v538_v36  ;;  %1300 = vmatpush3.msra.mxu0 %v700_v35  ;;  %v1366_v35 = vpack.c.bf16 %v1003_v32, %v1002_v31 }
 0x502   :  { %1356 = vmatprep.subr.bf16.mxu0 %v1442_v7 }
 0x503   :  { %v1408_v37 = vpop.eup %1407 }
 0x504   :  { %v544_v38 = vmul.f32 %v1408_v37, %v1400_v23  ;;  %v624_v39 = vpop.permute.xlu0 %623  ;;  %v776_v40 = vpop.permute.xlu1 %775  ;;  %v975_v23 = vld [vmem:[%s1749_s8] sm:$0xf] }
 0x505   :  { %1295 = vmatpush3.msra.mxu1 %v624_v39 }
 0x506   :  { %1297 = vmatmul.mubr.msk.f32.vlgmr.msra.gmra.mrb[8].mxu1 %vm191_vm3, %v544_v38  ;;  %1304 = vmatprep.subr.mxu1 %v1444_v33 }
 0x507   :  { %v1410_v41 = vpop.eup %1409  ;;  %1305 = vmatpush3.msra.mxu1 %v776_v40  ;;  %1306 = vmatprep.mubr.msk.f32.mxu1 %vm1443_vm2, %v1444_v33 }
 0x508   :  { %v545_v42 = vmul.f32 %v1410_v41, %v1402_v25  ;;  %1362 = vmatprep.subr.bf16.mxu1 %v1442_v7  ;;  %v1214_v41 = vld [vmem:[%s1752_s11] ss:$0 sm:$0xff] }
 0x50a   :  { %1302 = vmatmul.mubr.msk.f32.vlgmr.msra.gmra.mrb[4].mxu0 %vm191_vm3, %v545_v42 }
 0x50b   :  { %v1412_v43 = vpop.eup %1411  ;;  %1317 = vmatprep.mubr.msk.f32.mxu0 %vm1443_vm2, %v1444_v33  ;;  %1358 = vmatpush3.bf16.msra.mxu0 %v1357_v49  ;;  %v1369_v49 = vpack.c.bf16 %v1095_v48, %v1094_v47 }
 0x50c   :  { %v546_v44 = vmul.f32 %v1412_v43, %v1404_v27  ;;  %1359 = vmatprep.subr.bf16.mxu0 %v1442_v7 }
 0x50e   :  { %1307 = vmatmul.mubr.msk.f32.vlgmr.msra.gmra.mrb[10].mxu1 %vm191_vm3, %v546_v44 }
 0x50f   :  { %1328 = vmatprep.mubr.msk.f32.mxu1 %vm1443_vm2, %v1444_v33  ;;  %1361 = vmatpush3.bf16.msra.mxu0 %v1360_v52  ;;  %v1372_v52 = vpack.c.bf16 %v1097_v51, %v1096_v50 }
 0x510   :  { %1368 = vmatprep.subr.bf16.mxu0 %v1442_v7 }
 0x570   :  { %v619_v45 = vpop.f32.mrb[2].mxu0 }
 0x571   :  { %v1293_v46 = vpop.f32.mrb[3].mxu0 }
 0x5d9   :  { %v695_v53 = vpop.f32.mrb[8].mxu1 }
 0x5da   :  { %852 = vrot.lane.b32.xlu0 %v695_v53, %s1450_s21  ;;  %v1298_v54 = vpop.f32.mrb[9].mxu1  ;;  %v1098_v53 = vld [vmem:[%s1753_s12 + $0x20] sm:$0xff] }
 0x5db   :  { %v1099_v54 = vld [vmem:[%s1753_s12 + $0x28] sm:$0xff] }
 0x5dd   :  { %v771_v55 = vpop.f32.mrb[4].mxu0 }
 0x5de   :  { %856 = vrot.lane.b32.xlu1 %v771_v55, %s1451_s22  ;;  %v1303_v56 = vpop.f32.mrb[5].mxu0  ;;  %v1375_v55 = vpack.c.bf16 %v1099_v54, %v1098_v53 }
 0x5df   :  { %v1100_v56 = vld [vmem:[%s1753_s12 + $0x30] sm:$0xff] }
 0x5e1   :  { %v847_v57 = vpop.f32.mrb[10].mxu1 }
 0x5e2   :  { %860 = vrot.lane.b32.xlu0 %v847_v57, %s1452_s23  ;;  %v1308_v58 = vpop.f32.mrb[11].mxu1  ;;  %v1101_v57 = vld [vmem:[%s1753_s12 + $0x38] sm:$0xff]  ;;  %s1417_s12 = scalar_lea.vmem %s1191_s26, 128 }
 0x5e3   :  { %v1378_v58 = vpack.c.bf16 %v1101_v57, %v1100_v56  ;;  %p1418_p0 = scmp.ne.s32.totalorder %s1191_s26, %s1417_s12  ;;  %p1423_p2 = scmp.lt.s32.totalorder %s1417_s12, %s1417_s12 }
 0x5e5   :  { %p1424_p3 = por %p1423_p2, %p1422_p1 }
 0x5e7   :  { %p1425_p4 = pnand %p1424_p3, %p1418_p0 }
 0x64c   :  { %v853_v59 = vpop.permute.xlu0 %852 }
 0x64d   :  { %v863_v61 = vsel %vm191_vm3, %v619_v45, %v853_v59 }
 0x650   :  { %v857_v60 = vpop.permute.xlu1 %856 }
 0x651   :  { %v865_v62 = vsel %vm864_vm4, %v863_v61, %v857_v60 }
 0x654   :  { %v861_v63 = vpop.permute.xlu0 %860 }
 0x655   :  { %v867_v1 = vsel %vm866_vm5, %v865_v62, %v861_v63 }
 0x656   :  { %1318 = vmatmul.mubr.msk.f32.vlgmr.msra.gmra.mrb[6].mxu0 %vm49_vm0, %v867_v1 }
 0x657   :  { %1347 = vmatprep.mubr.msk.f32.mxu0 %vm1443_vm2, %v1444_v33  ;;  %v1000_v33 = vld [vmem:[%s1751_s10] sm:$0xff]  ;;  %1370 = vmatpush3.bf16.msra.mxu0 %v1369_v49 }
 0x658   :  { %1371 = vmatprep.subr.bf16.mxu0 %v1442_v7 }
 0x65b   :  { %1373 = vmatpush3.bf16.msra.mxu0 %v1372_v52 }
 0x65c   :  { %1374 = vmatprep.subr.bf16.mxu0 %v1442_v7 }
 0x65f   :  { %1376 = vmatpush3.bf16.msra.mxu0 %v1375_v55 }
 0x660   :  { %1377 = vmatprep.subr.bf16.mxu0 %v1442_v7 }
 0x663   :  { %1379 = vmatpush3.bf16.msra.mxu0 %v1378_v58 }
 0x729   :  { %v941_v2 = vpop.f32.mrb[6].mxu0 }
 0x72a   :  { %v945_v4 = vadd.f32 %v941_v2, %v1532_v0  ;;  %v1319_v5 = vpop.f32.mrb[7].mxu0  ;;  %v1001_v0 = vld [vmem:[%s1751_s10 + $0x8] sm:$0xff] }
 0x72b   :  { %v1363_v11 = vpack.c.bf16 %v1001_v0, %v1000_v33 }
 0x72c   :  { %v1662_v6 = vadd.f32 %v1213_v3, %v945_v4 }
 0x72d   :  { %1364 = vmatpush3.bf16.msra.mxu1 %v1363_v11 }
 0x72e   :  { %v954_v8 = vsel %vm49_vm0, %v1662_v6, 0.0  ;;  %v957_v9 = vmul.f32 %v1662_v6, %v1662_v6  ;;  %1365 = vmatprep.subr.bf16.mxu1 %v1442_v7  ;;  %v1216_v7 = vld [vmem:[%s1754_s13] ss:$0 sm:$0xff] }
 0x72f   :  { %955 = vadd.xlane.f32.xlu1 %v954_v8 }
 0x730   :  { %v958_v10 = vsel %vm49_vm0, %v957_v9, 0.0 }
 0x731   :  { %959 = vadd.xlane.f32.xlu0 %v958_v10  ;;  %1367 = vmatpush3.bf16.msra.mxu1 %v1366_v35 }
 0x7bc   :  { %v956_v12 = vpop.xlane.xlu1 %955 }
 0x7bd   :  { %v962_v13 = vrot.slane %v956_v12, 4 }
 0x7be   :  { %v960_v14 = vpop.xlane.xlu0 %959 }
 0x7bf   :  { %v964_v15 = vadd.f32 %v962_v13, %v956_v12  ;;  %v966_v16 = vrot.slane %v960_v14, 4 }
 0x7c1   :  { %v969_v17 = vmul.f32 0.015625, %v964_v15  ;;  %v968_v18 = vadd.f32 %v966_v16, %v960_v14 }
 0x7c3   :  { %v971_v19 = vmul.f32 %v969_v17, %v969_v17  ;;  %v970_v20 = vmul.f32 0.015625, %v968_v18 }
 0x7c5   :  { %v972_v21 = vsub.f32 %v970_v20, %v971_v19 }
 0x7c7   :  { %v973_v22 = vadd.f32 1e-05, %v972_v21 }
 0x7c9   :  { %1413 = vrsqrt.f32 %v973_v22 }
 0x7d3   :  { %v1414_v24 = vpop.eup %1413 }
 0x7d4   :  { %v976_v25 = vmul.f32 %v1414_v24, %v975_v23 }
 0x7d6   :  { %v981_v27 = vrot.slane %v976_v25, 4  ;;  %v978_v28 = vmul.f32 %v976_v25, %v969_v17 }
 0x7d8   :  { %v983_v29 = vsel %vm80_vm1, %v976_v25, %v981_v27  ;;  %v979_v30 = vsub.f32 %v977_v26, %v978_v28 }
 0x7d9   :  { %990 = vperm.xlu0 %1394, %v983_v29  }
 0x7da   :  { %v985_v34 = vrot.slane %v979_v30, 4 }
 0x7dc   :  { %v987_v36 = vsel %vm80_vm1, %v979_v30, %v985_v34 }
 0x7dd   :  { %996 = vperm.xlu1 %1393, %v987_v36  }
 0x858   :  { %v991_v37 = vpop.permute.xlu0 %990 }
 0x859   :  { %v993_v38 = vmul.f32 %v991_v37, %v1662_v6 }
 0x85c   :  { %v997_v39 = vpop.permute.xlu1 %996 }
 0x85d   :  { %v999_v40 = vadd.f32 %v997_v39, %v993_v38 }
 0x85f   :  { %1329 = vmatmul.mubr.msk.f32.vlgmr.msra.gmra.mrb[12].mxu1 %vm49_vm0, %v999_v40 }
 0x932   :  { %v1080_v42 = vpop.f32.mrb[12].mxu1 }
 0x933   :  { %v1081_v43 = vadd.f32 %v1214_v41, %v1080_v42  ;;  %v1330_v44 = vpop.f32.mrb[13].mxu1 }
 0x935   :  { %v1084_v45 = vmul.f32 %v1081_v43, %v1081_v43 }
 0x937   :  { %v1086_v46 = vsel %vm1085_vm6, %v1084_v45, 0.0 }
 0x938   :  { %1087 = vadd.xlane.f32.xlu1 %v1086_v46 }
 0x9c5   :  { %v1088_v59 = vpop.xlane.xlu1 %1087 }
 0x9c6   :  { %v1089_v60 = vmul.f32 0.015625, %v1088_v59 }
 0x9c8   :  { %v1090_v61 = vadd.f32 1e-06, %v1089_v60 }
 0x9ca   :  { %1415 = vrsqrt.f32 %v1090_v61 }
 0x9d4   :  { %v1416_v62 = vpop.eup %1415 }
 0x9d5   :  { %v1092_v63 = vmul.f32 %v1416_v62, %v1081_v43 }
 0x9d7   :  { %v1093_v1 = vmax.f32 %v1092_v63, 0.0 }
 0x9d9   :  { %1348 = vmatmul.mubr.msk.f32.vlgmr.msra.gmra.mrb[8].mxu0 %vm1085_vm6, %v1093_v1 }
 0xaac   :  { %v1178_v2 = vpop.f32.mrb[8].mxu0 }
 0xaad   :  { %v1179_v3 = vadd.f32 %v1216_v7, %v1178_v2  ;;  %v1349_v4 = vpop.f32.mrb[9].mxu0 }
 0xaaf   :  { %v1182_v5 = vadd.f32 %v1179_v3, %v1662_v6 }
 0xab1   :  { %1183 = vst.msk [vmem:[#allocation2] sm:$0xff] %vm49_vm0, %v1182_v5 }
 0xab2   :  { %1428 = shalt.err (!%p1425_p4)
}
 0xab3   :  { %s1429_s13 = scalar_lea.hbm %s1755_s14, 128 }
 0xab4   :  { %p1430_p5 = scmp.ne.s32.totalorder %s1755_s14, %s1429_s13  ;;  %p1433_p6 = scmp.lt.u32.totalorder %s1429_s13, %s1755_s14 }
 0xab6   :  { %p1435_p7 = pnand %p1433_p6, %p1430_p5 }
 0xab8   :  { %1438 = shalt.err (!%p1435_p7)
}
 0xab9   :  { %1193 = dma.vmem_to_hbm [thread:$0]  %s1191_s26, 128, %s1755_s14, [#allocation3]  }
 0xaba   :  { %1439 = dma.done.wait [#allocation3], 128  }
 0xabb   :  { %1440 = vsyncadd [#allocation3], 4294967168 }
 0xabc   :  { %1197 = vsyncpa [#allocation3], 1 }

</bundles_post_ra>
